<compile_context>
chip_gen: v7x
topology: tpu7x:2x2x1
jax: 0.10.0
libtpu: 0.0.40
codegen_flags: <defaults>
</compile_context>

<pallas_src>
import functools
import math

import jax
import jax.numpy as jnp
from jax.experimental import pallas as pl
from jax.experimental.pallas import tpu as pltpu


_MAX_BLOCK_LANES = 4096            # f32 lanes per output-block row (16 KiB / row)
_TARGET_OUT_BLOCK_BYTES = 2 << 20  # ~2 MiB output blocks: >=1 MiB is near roofline,
                                   # and 2x2 MiB + temps stays well inside v5e's 16 MiB
_MAX_REPL_BYTES = 2 << 20          # cap on the VMEM-resident replication matrix


def _one_hot_kernel(x_ref, repl_ref, cls_ref, o_ref, *, ts, seq_blocked):
    """One output block: o[b, l] = 1.0 iff x[b, l // C] == l % C (block-local)."""
    if seq_blocked:
        xi = x_ref[...]                                    # (tb, ts) int32
    else:
        j = pl.program_id(1)
        start = pl.multiple_of(j * ts, ts)
        xi = x_ref[:, pl.ds(start, ts)]                    # (tb, ts) int32
    # Repeat each index C times along lanes on the otherwise-idle MXU:
    #   x_rep[b, l] = x[b, l // C]   via   repl[s, l] = 1 iff l // C == s.
    xf = xi.astype(jnp.float32).astype(repl_ref.dtype)
    x_rep = jnp.dot(xf, repl_ref[...],
                    preferred_element_type=jnp.float32)    # (tb, ts*C), exact ints
    # cls_ref[0, l] = l % C (exact ints); matmul is exact, so plain equality.
    o_ref[...] = (x_rep == cls_ref[...]).astype(o_ref.dtype)


def _choose_seq_tile(S: int, C: int, repl_itemsize: int) -> int:
    """Largest ts with: ts | S, (ts*C) % 128 == 0 (when tiled), and bounded
    output-lane / replication-matrix footprints."""
    if S * C <= _MAX_BLOCK_LANES and S * S * C * repl_itemsize <= _MAX_REPL_BYTES:
        return S                                  # whole row in one lane-dense block
    granule = 128 // math.gcd(C, 128)             # smallest ts with (ts*C) % 128 == 0
    max_ts_lanes = max(1, _MAX_BLOCK_LANES // C)
    max_ts_repl = int(math.isqrt(max(1, _MAX_REPL_BYTES // (C * repl_itemsize))))
    max_ts = min(S, max(granule, min(max_ts_lanes, max_ts_repl)))
    ts = None
    t = granule
    while t <= max_ts:
        if S % t == 0:
            ts = t
        t += granule
    if ts is None:
        # No lane-aligned divisor of S under budget: fall back to the full row
        # (block == full dim satisfies the layout rule); batch tiling below
        # still bounds the block bytes where divisibility allows.
        ts = S
    return ts


def _choose_batch_tile(B: int, out_row_bytes: int) -> int:
    """Largest tb (multiple of 8, divisor of B) with tb*out_row_bytes <= target."""
    if B % 8 != 0:
        return B                                   # block == full dim (can't tile sublanes)
    max_tb = max(8, (_TARGET_OUT_BLOCK_BYTES // max(out_row_bytes, 1)) // 8 * 8)
    if B <= max_tb:
        return B
    tb = max_tb
    while tb >= 8 and B % tb != 0:
        tb -= 8
    return tb if tb >= 8 else B


def one_hot_pallas(x: jax.Array, num_classes: int) -> jax.Array:
    """Equivalent of OneHot(num_classes).forward(x): (B, ...) int -> (B, prod*C) f32."""
    assert x.ndim >= 1, "expected at least a batch dimension"
    B = x.shape[0]
    x2 = x.reshape(B, -1).astype(jnp.int32)        # flatten trailing dims (same layout)
    S = x2.shape[1]
    C = int(num_classes)

    # bf16 MXU path is exact only while class indices fit bf16 integers.
    mm_dtype = jnp.bfloat16 if C <= 255 else jnp.float32
    repl_itemsize = jnp.dtype(mm_dtype).itemsize

    ts = _choose_seq_tile(S, C, repl_itemsize)
    out_row_bytes = ts * C * 4

    # Pad batch to a multiple of 8 only when batch tiling is actually needed.
    Bp, pad_b = B, 0
    if B % 8 != 0 and B * out_row_bytes > _TARGET_OUT_BLOCK_BYTES:
        pad_b = (-B) % 8
        Bp = B + pad_b
        x2 = jnp.pad(x2, ((0, pad_b), (0, 0)))     # index 0 rows; sliced off below

    tb = _choose_batch_tile(Bp, out_row_bytes)
    assert Bp % tb == 0 and S % ts == 0
    nb, ns = Bp // tb, S // ts

    # Grid-invariant constants (hoisted out of the kernel; DMA'd once, resident).
    lane = jnp.arange(ts * C, dtype=jnp.int32)
    seq = jnp.arange(ts, dtype=jnp.int32)
    repl = (lane[None, :] // C == seq[:, None]).astype(mm_dtype)        # (ts, ts*C)
    cls = (lane % C).astype(jnp.float32).reshape(1, ts * C)             # (1, ts*C)

    # Block the index input over seq when the tile is lane-aligned; otherwise
    # keep the full row resident per batch tile and slice in-kernel.
    seq_blocked = (ts == S) or (ts % 128 == 0)
    if seq_blocked:
        x_spec = pl.BlockSpec((tb, ts), lambda i, j: (i, j))
    else:
        x_spec = pl.BlockSpec((tb, S), lambda i, j: (i, 0))

    out = pl.pallas_call(
        functools.partial(_one_hot_kernel, ts=ts, seq_blocked=seq_blocked),
        out_shape=jax.ShapeDtypeStruct((Bp, S * C), jnp.float32),
        grid=(nb, ns),
        in_specs=[x_spec,
                  pl.BlockSpec((ts, ts * C), lambda i, j: (0, 0)),      # repl (resident)
                  pl.BlockSpec((1, ts * C), lambda i, j: (0, 0))],      # cls  (resident)
        out_specs=pl.BlockSpec((tb, ts * C), lambda i, j: (i, j)),
        compiler_params=pltpu.CompilerParams(
            dimension_semantics=(pltpu.PARALLEL, pltpu.PARALLEL)),
    )(x2, repl, cls)

    return out[:B] if pad_b else out


if __name__ == "__main__":
    key = jax.random.PRNGKey(0)

    def _check(B, S, C, k):
        x = jax.random.randint(k, (B, S), 0, C, dtype=jnp.int32)
        out = jax.block_until_ready(one_hot_pallas(x, C))
        ref = jax.nn.one_hot(x, C, dtype=jnp.float32).reshape(B, -1)
        assert out.shape == (B, S * C) and out.dtype == jnp.float32, (B, S, C)
        assert jnp.array_equal(out, ref), (B, S, C)

    k0, k1, k2, k3 = jax.random.split(key, 4)
    _check(2, 8, 32, k0)      # module-scale shape (batch=2, seq=8, num_classes=32)
    _check(4, 6, 5, k1)       # non-power-of-two num_classes, tiny full-dim blocks
    _check(8, 256, 32, k2)    # lane-tiled grid (ns > 1) with 128-aligned seq blocks
    _check(8, 512, 48, k3)    # lane-tiled grid with unaligned ts -> in-kernel slice path

    print("KERNEL_OK")
</pallas_src>

<mosaic_0001>
module attributes {stable_mosaic.version = 11 : i64} {
  func.func @_one_hot_kernel(%arg0: i32, %arg1: i32, %arg2: memref<2x8xi32, #tpu.memory_space<vmem>>, %arg3: memref<8x256xbf16, #tpu.memory_space<vmem>>, %arg4: memref<1x256xf32, #tpu.memory_space<vmem>>, %arg5: memref<2x256xf32, #tpu.memory_space<vmem>>) attributes {dimension_semantics = [#tpu.dimension_semantics<parallel>, #tpu.dimension_semantics<parallel>], iteration_bounds = array<i64: 1, 1>, scalar_prefetch = 0 : i64, scratch_operands = 0 : i64, tpu.core_type = #tpu.core_type<tc>, window_params = [{transform_indices = @transform_0, window_bounds = array<i64: 2, 8>}, {pipeline_mode = #tpu.pipeline_mode<synchronous>, transform_indices = @transform_1, window_bounds = array<i64: 8, 256>}, {pipeline_mode = #tpu.pipeline_mode<synchronous>, transform_indices = @transform_2, window_bounds = array<i64: 1, 256>}, {transform_indices = @transform_3, window_bounds = array<i64: 2, 256>}]} {
    %c0 = arith.constant 0 : index
    %c0_0 = arith.constant 0 : index
    %0 = vector.load %arg2[%c0, %c0_0] : memref<2x8xi32, #tpu.memory_space<vmem>>, vector<2x8xi32>
    %1 = arith.sitofp %0 : vector<2x8xi32> to vector<2x8xf32>
    %2 = arith.truncf %1 : vector<2x8xf32> to vector<2x8xbf16>
    %c0_1 = arith.constant 0 : index
    %c0_2 = arith.constant 0 : index
    %3 = vector.load %arg3[%c0_1, %c0_2] : memref<8x256xbf16, #tpu.memory_space<vmem>>, vector<8x256xbf16>
    %cst = arith.constant dense<0.000000e+00> : vector<2x256xf32>
    %4 = tpu.matmul %2, %3, %cst {dimension_numbers = #tpu.dot_dimension_numbers<[1], [0], [0], [1], [0, 0, 1, 1], [], []>} : vector<2x8xbf16>, vector<8x256xbf16>, vector<2x256xf32> -> vector<2x256xf32>
    %c0_3 = arith.constant 0 : index
    %c0_4 = arith.constant 0 : index
    %5 = vector.load %arg4[%c0_3, %c0_4] : memref<1x256xf32, #tpu.memory_space<vmem>>, vector<1x256xf32>
    %6 = vector.broadcast %5 : vector<1x256xf32> to vector<2x256xf32>
    %7 = arith.cmpf oeq, %4, %6 : vector<2x256xf32>
    %8 = arith.extui %7 : vector<2x256xi1> to vector<2x256xi32>
    %9 = arith.sitofp %8 : vector<2x256xi32> to vector<2x256xf32>
    %c0_5 = arith.constant 0 : index
    %c0_6 = arith.constant 0 : index
    %10 = vector.load %arg5[%c0_5, %c0_6] : memref<2x256xf32, #tpu.memory_space<vmem>>, vector<2x256xf32>
    tpu.vector_store %arg5[%c0_5, %c0_6], %9 {strides = array<i32>} : memref<2x256xf32, #tpu.memory_space<vmem>>, vector<2x256xf32>,
    return
  }
  func.func @transform_0(%arg0: i32, %arg1: i32) -> (i32, i32) {
    %c0_i32 = arith.constant 0 : i32
    return %arg0, %arg1 : i32, i32
  }
  func.func @transform_1(%arg0: i32, %arg1: i32) -> (i32, i32) {
    %c0_i32 = arith.constant 0 : i32
    %c0_i32_0 = arith.constant 0 : i32
    %c0_i32_1 = arith.constant 0 : i32
    return %c0_i32, %c0_i32_0 : i32, i32
  }
  func.func @transform_2(%arg0: i32, %arg1: i32) -> (i32, i32) {
    %c0_i32 = arith.constant 0 : i32
    %c0_i32_0 = arith.constant 0 : i32
    %c0_i32_1 = arith.constant 0 : i32
    return %c0_i32, %c0_i32_0 : i32, i32
  }
  func.func @transform_3(%arg0: i32, %arg1: i32) -> (i32, i32) {
    %c0_i32 = arith.constant 0 : i32
    return %arg0, %arg1 : i32, i32
  }
}

</mosaic_0001>

<bundles_post_ra>
// kernel: tpu_custom_call.1
= control target key start
LH: loop header
LB: loop body
LE: loop exit
PB: predicated region body
PF: predicated region fallthrough
CT: control target
= control target key end

     0   :  { %8 = vsyncpa [#allocation3], 0  ;;  %s297_s0 = inlined_call_operand.hbm [shape: s32[2,8], index: 0, kind: input, shape index: {}]   ;;  %s298_s1 = inlined_call_operand.hbm [shape: bf16[8,256], index: 1, kind: input, shape index: {}]   ;;  %s299_s2 = inlined_call_operand.vmem [shape: f32[1,256], index: 2, kind: input, shape index: {}]   ;;  %s300_s3 = inlined_call_operand.hbm [shape: f32[2,256], index: 3, kind: output, shape index: {}]  }
   0x1   :  { %9 = vsyncpa [#allocation6], 0 }
   0x2   :  { %10 = vsyncpa [#allocation4], 0  ;;  %s233_s12 = smov [#allocation2]   ;;  %s234_s14 = smov [#allocation5]  }
   0x3   :  { %s17_s13 = sshll.u32 %s233_s12, 4  ;;  %s27_s15 = sshll.u32 %s234_s14, 4  ;;  %s18_s13 = int_to_ptr.vmem [resolvable:$true] %s17_s13  ;;  %s28_s15 = int_to_ptr.vmem [resolvable:$true] %s27_s15 }
   0x4   :  { %s161_s18 = scalar_lea.hbm %s297_s0, 32 }
   0x5   :  { %p162_p0 = scmp.ne.s32.totalorder %s297_s0, %s161_s18  ;;  %p165_p1 = scmp.lt.u32.totalorder %s161_s18, %s297_s0 }
   0x7   :  { %p167_p2 = pnand %p165_p1, %p162_p0 }
   0x9   :  { %170 = shalt.err (!%p167_p2)
}
   0xa   :  { %s171_s23 = scalar_lea.vmem %s18_s13, 32  ;;  %p176_p4 = scmp.lt.s32.totalorder %s18_s13, %s18_s13 }
   0xb   :  { %p172_p3 = scmp.ne.s32.totalorder %s18_s13, %s171_s23  ;;  %p177_p5 = scmp.lt.s32.totalorder %s171_s23, %s171_s23 }
   0xd   :  { %p178_p6 = por %p177_p5, %p176_p4 }
   0xf   :  { %p179_p7 = pnand %p178_p6, %p172_p3 }
  0x11   :  { %182 = shalt.err (!%p179_p7)
}
  0x12   :  { %20 = dma.hbm_to_vmem [thread:$0]  %s297_s0, 32, %s18_s13, [#allocation3]  }
  0x13   :  { %s183_s28 = scalar_lea.hbm %s298_s1, 128 }
  0x14   :  { %p184_p8 = scmp.ne.s32.totalorder %s298_s1, %s183_s28  ;;  %p187_p9 = scmp.lt.u32.totalorder %s183_s28, %s298_s1 }
  0x16   :  { %p189_p10 = pnand %p187_p9, %p184_p8 }
  0x18   :  { %192 = shalt.err (!%p189_p10)
}
  0x19   :  { %s193_s6 = scalar_lea.vmem %s28_s15, 128  ;;  %p198_p12 = scmp.lt.s32.totalorder %s28_s15, %s28_s15 }
  0x1a   :  { %p194_p11 = scmp.ne.s32.totalorder %s28_s15, %s193_s6  ;;  %p199_p13 = scmp.lt.s32.totalorder %s193_s6, %s193_s6 }
  0x1c   :  { %p200_p0 = por %p199_p13, %p198_p12 }
  0x1e   :  { %p201_p1 = pnand %p200_p0, %p194_p11 }
  0x20   :  { %204 = shalt.err (!%p201_p1)
}
  0x21   :  { %30 = dma.hbm_to_vmem [thread:$0]  %s298_s1, 128, %s28_s15, [#allocation6]  }
  0x22   :  { %227 = dma.done.wait [#allocation3], 32  }
  0x23   :  { %228 = vsyncadd [#allocation3], 4294967264 }
  0x24   :  { %229 = dma.done.wait [#allocation6], 128  }
  0x25   :  { %230 = vsyncadd [#allocation6], 4294967168  ;;  %v235_v0 = vmov 0   ;;  %v43_v1 = vld [vmem:[#allocation5] sm:$0xff]  ;;  %vm53_vm0 = vcmask 1043456   ;;  %vm49_vm1 = vcmask 64512   ;;  %v103_v8 = vlaneseq }
  0x26   :  { %92 = vmatprep.mubr.bf16.mxu0 %v235_v0  ;;  %v40_v2 = vld [vmem:[#allocation2] sm:$0x3]  ;;  %v148_v3 = vcombine.high %v43_v1, %v43_v1  ;;  %v147_v4 = vcombine.low %v43_v1, %v43_v1  ;;  %s236_s9 = smov [#allocation7]   ;;  %v237_v17 = vmov 0.0  }
  0x27   :  { %v41_v5 = vcvt.s32.f32 %v40_v2  ;;  %v104_v9 = vshrl.u32 %v103_v8, 7  ;;  %v101_v11 = vld [vmem:[%s299_s2] sm:$0x3]  ;;  %s137_s10 = sshll.u32 %s236_s9, 4  ;;  %s138_s10 = int_to_ptr.vmem [resolvable:$true] %s137_s10 }
  0x28   :  { %149 = vmatprep.subr.msk.bf16.mxu0 %vm53_vm0, %v148_v3  ;;  %v55_v6 = vsel %vm53_vm0, %v147_v4, 0  ;;  %s205_s11 = scalar_lea.vmem %s138_s10, 64  ;;  %p210_p3 = scmp.lt.s32.totalorder %s138_s10, %s138_s10 }
  0x29   :  { %v42_v7 = vpack.c.bf16 %v41_v5, %v41_v5  ;;  %61 = vmatpush1.bf16.msra.mxu0 %v55_v6  ;;  %v105_v10 = vsub.s32 0, %v104_v9  ;;  %v109_v12 = vsub.s32 1, %v104_v9  ;;  %p206_p2 = scmp.ne.s32.totalorder %s138_s10, %s205_s11  ;;  %p211_p4 = scmp.lt.s32.totalorder %s205_s11, %s205_s11 }
  0x2b   :  { %v106_v13 = vrot.slane %v101_v11, %v105_v10  ;;  %v110_v14 = vrot.slane %v101_v11, %v109_v12  ;;  %p212_p5 = por %p211_p4, %p210_p3 }
  0x2c   :  { %150 = vmatmul.mubr.msk.bf16.vlgmr.msra.gmra.mrb[0].mxu0 %vm49_vm1, %v42_v7 }
  0x2d   :  { %p213_p6 = pnand %p212_p5, %p206_p2 }
  0xff   :  { %v94_v15 = vpop.f32.mrb[0].mxu0 }
 0x100   :  { %vm113_vm2 = vcmp.eq.f32.partialorder %v94_v15, %v106_v13  ;;  %v96_v16 = vpop.f32.mrb[1].mxu0 }
 0x101   :  { %v151_v18 = vsel %vm113_vm2, 1.0, %v237_v17  ;;  %vm114_vm3 = vcmp.eq.f32.partialorder %v96_v16, %v110_v14  ;;  %v98_v19 = vpop.f32.mrb[2].mxu0 }
 0x102   :  { %v152_v20 = vsel %vm114_vm3, 1.0, %v237_v17  ;;  %v99_v21 = vpop.f32.mrb[3].mxu0 }
 0x103   :  { %v121_v22 = vcombine.low %v151_v18, %v152_v20 }
 0x105   :  { %153 = vst.sshfl [vmem:[#allocation7] sm:$0x33 pattern:$0x76325410] %v121_v22 }
 0x106   :  { %216 = shalt.err (!%p213_p6)
}
 0x107   :  { %s217_s13 = scalar_lea.hbm %s300_s3, 64 }
 0x108   :  { %p218_p7 = scmp.ne.s32.totalorder %s300_s3, %s217_s13  ;;  %p221_p8 = scmp.lt.u32.totalorder %s217_s13, %s300_s3 }
 0x10a   :  { %p223_p9 = pnand %p221_p8, %p218_p7 }
 0x10c   :  { %226 = shalt.err (!%p223_p9)
}
 0x10d   :  { %140 = dma.vmem_to_hbm [thread:$0]  %s138_s10, 64, %s300_s3, [#allocation4]  }
 0x10e   :  { %231 = dma.done.wait [#allocation4], 64  }
 0x10f   :  { %232 = vsyncadd [#allocation4], 4294967232 }
 0x110   :  { %144 = vsyncpa [#allocation3], 1 }
 0x111   :  { %145 = vsyncpa [#allocation6], 1 }
 0x112   :  { %146 = vsyncpa [#allocation4], 1 }

</bundles_post_ra>
